<compile_context>
chip_gen: v7x
topology: tpu7x:2x2x1
jax: 0.10.0
libtpu: 0.0.40
codegen_flags: <defaults>
</compile_context>

<pallas_src>
import functools

import jax
import jax.numpy as jnp
from jax.experimental import pallas as pl
from jax.experimental.pallas import tpu as pltpu


def _derive_vmem_limit():
    default = 64 * 1024 * 1024
    try:
        cap = getattr(pltpu.get_tpu_info(), "vmem_capacity_bytes", default)
    except Exception:
        cap = default
    return min(int(cap) * 3 // 4, 96 * 1024 * 1024)


_VMEM_LIMIT = _derive_vmem_limit()
_FINAL_CPAD = 128        # lane-dense channel padding for the 1-channel tail
_MM_TILE_TARGET = 512    # target rows per fused-matmul tile
_ROW_TILE_TARGET = 1024  # target output pixels per direct-conv tile


# ----------------------------------------------------------------------------
# tiling helpers
# ----------------------------------------------------------------------------
def _pick_tile(m, target=_MM_TILE_TARGET):
    """Largest multiple-of-8 divisor of m that is <= target (or m itself)."""
    if m <= target:
        return m
    best = None
    for d in range(8, target + 1, 8):
        if m % d == 0:
            best = d
    return best if best is not None else m


def _row_tile(h, w, target_pix=_ROW_TILE_TARGET):
    """Pick tr | h so that tr*w is a legal, moderate output tile."""
    best = 1
    for d in range(1, h + 1):
        if h % d == 0 and d * w <= target_pix:
            best = d
    if (best * w) % 8 != 0 and best != h:
        best = h                      # full block is always legal
    return best


def _fold_bn(bias, bn, cout):
    """Return (scale, shift) so that y = conv*scale + shift == BN(conv + bias)."""
    b = bias if bias is not None else jnp.zeros((cout,), jnp.float32)
    if bn is None:
        return jnp.ones((cout,), jnp.float32), b
    gamma, beta, mean, var = bn
    scale = gamma * jax.lax.rsqrt(var + 1e-5)
    shift = (b - mean) * scale + beta
    return scale, shift


# ----------------------------------------------------------------------------
# Pallas kernels
# ----------------------------------------------------------------------------
def _matmul_kernel(a_ref, w_ref, shift_ref, o_ref, *, relu):
    # a: (tm, K) bf16, w: (K, C) bf16 (BN scale folded in), shift: (1, C) f32.
    acc = jnp.dot(a_ref[...], w_ref[...], preferred_element_type=jnp.float32)
    y = acc + shift_ref[...]
    if relu:
        y = jnp.maximum(y, 0.0)
    o_ref[...] = y.astype(o_ref.dtype)


def fused_matmul(a, w, shift, relu):
    """(M,K)bf16 @ (K,C)bf16 -> (M,C)bf16 with fused shift + optional ReLU."""
    m, k = a.shape
    _, c = w.shape
    tm = _pick_tile(m)
    return pl.pallas_call(
        functools.partial(_matmul_kernel, relu=relu),
        out_shape=jax.ShapeDtypeStruct((m, c), jnp.bfloat16),
        grid=(m // tm,),
        in_specs=[
            pl.BlockSpec((tm, k), lambda i: (i, 0)),
            pl.BlockSpec((k, c), lambda i: (0, 0)),
            pl.BlockSpec((1, c), lambda i: (0, 0)),
        ],
        out_specs=pl.BlockSpec((tm, c), lambda i: (i, 0)),
        compiler_params=pltpu.CompilerParams(
            dimension_semantics=("parallel",),
            vmem_limit_bytes=_VMEM_LIMIT,
        ),
    )(a, w, shift)


def _conv3x3_kernel(x_ref, w_ref, shift_ref, *rest, tr, wo, relu, has_res):
    # x_ref : (1, (H+4)*W, Cin) bf16  -- height-padded, row-flattened activation
    # w_ref : (9, Cin, Cout)    bf16  -- per-tap weights, BN scale folded in
    # shift : (1, Cout)         f32
    # res   : (1, tr*W, Cout)   bf16  (optional residual, added before ReLU)
    # out   : (1, tr*W, Cout)   bf16
    if has_res:
        res_ref, o_ref = rest
    else:
        (o_ref,) = rest
    cout = w_ref.shape[2]
    tm = tr * wo
    row0 = pl.program_id(1) * tr
    # output-column index of every row of the flattened tile (for edge masking)
    col = jax.lax.broadcasted_iota(jnp.int32, (tm, 1), 0) % wo

    acc = jnp.zeros((tm, cout), jnp.float32)
    for di in range(3):
        for dj in range(3):
            start = (row0 + di + 1) * wo + (dj - 1)
            patch = x_ref[0, pl.ds(start, tm), :]
            if dj == 0:                       # left tap: ow == 0 reads padding
                patch = jnp.where(col > 0, patch, 0)
            elif dj == 2:                     # right tap: ow == W-1 reads padding
                patch = jnp.where(col < wo - 1, patch, 0)
            acc = acc + jnp.dot(patch, w_ref[di * 3 + dj],
                                preferred_element_type=jnp.float32)

    y = acc + shift_ref[...]
    if has_res:
        y = y + res_ref[0].astype(jnp.float32)
    if relu:
        y = jnp.maximum(y, 0.0)
    o_ref[0] = y.astype(o_ref.dtype)


def conv3x3_bn_relu(x, w, bias, bn, relu, residual=None):
    """Direct 3x3 / stride-1 / pad-1 conv + folded BN + residual + ReLU."""
    n, h, wd, cin = x.shape
    cout, _, kh, kw = w.shape
    assert kh == 3 and kw == 3
    scale, shift = _fold_bn(bias, bn, cout)
    wtaps = (jnp.transpose(w, (2, 3, 1, 0)).reshape(9, cin, cout)
             * scale[None, None, :]).astype(jnp.bfloat16)
    # pad only the height (2 rows top, 2 bottom: 1 for the conv halo + slack),
    # flatten rows so every tap is a contiguous pl.ds slice in the kernel.
    xp = jnp.pad(x, ((0, 0), (2, 2), (0, 0), (0, 0))).reshape(n, (h + 4) * wd, cin)

    tr = _row_tile(h, wd)
    tm = tr * wd
    grid = (n, h // tr)
    in_specs = [
        pl.BlockSpec((1, (h + 4) * wd, cin), lambda b, r: (b, 0, 0)),
        pl.BlockSpec((9, cin, cout), lambda b, r: (0, 0, 0)),
        pl.BlockSpec((1, cout), lambda b, r: (0, 0)),
    ]
    args = [xp, wtaps, shift.reshape(1, cout)]
    has_res = residual is not None
    if has_res:
        in_specs.append(pl.BlockSpec((1, tm, cout), lambda b, r: (b, r, 0)))
        args.append(residual.reshape(n, h * wd, cout))

    kern = functools.partial(_conv3x3_kernel, tr=tr, wo=wd, relu=relu,
                             has_res=has_res)
    y = pl.pallas_call(
        kern,
        out_shape=jax.ShapeDtypeStruct((n, h * wd, cout), jnp.bfloat16),
        grid=grid,
        in_specs=in_specs,
        out_specs=pl.BlockSpec((1, tm, cout), lambda b, r: (b, r, 0)),
        compiler_params=pltpu.CompilerParams(
            dimension_semantics=("parallel", "parallel"),
            vmem_limit_bytes=_VMEM_LIMIT,
        ),
    )(*args)
    return y.reshape(n, h, wd, cout)


def _maxpool_kernel(p_ref, o_ref):
    # p: (1, 9, M, C) -> o: (1, M, C); tap axis kept OUT of the vreg dims.
    m = p_ref[0, 0]
    for t in range(1, p_ref.shape[1]):
        m = jnp.maximum(m, p_ref[0, t])
    o_ref[0] = m


# ----------------------------------------------------------------------------
# wrappers for stride-2 convs, transpose conv, maxpool
# ----------------------------------------------------------------------------
def _extract_patches(x, kh, kw, stride, pad, pad_value=0.0):
    """x: (N,H,W,C) -> patches (N, Ho*Wo, kh*kw, C), plus Ho, Wo."""
    n, h, w, c = x.shape
    ho = (h + 2 * pad - kh) // stride + 1
    wo = (w + 2 * pad - kw) // stride + 1
    xp = jnp.pad(x, ((0, 0), (pad, pad), (pad, pad), (0, 0)),
                 constant_values=pad_value)
    cols = []
    for i in range(kh):
        for j in range(kw):
            cols.append(xp[:, i:i + stride * ho:stride, j:j + stride * wo:stride, :])
    patches = jnp.stack(cols, axis=3)              # (N, Ho, Wo, kh*kw, C)
    return patches.reshape(n, ho * wo, kh * kw, c), ho, wo


def conv_bn_relu_matmul(x, w, bias, bn, stride, pad, relu):
    """Conv2d via (batch-folded, M-tiled) matmul. Used for stride-2 / 1x1 convs."""
    # TODO(synk): stride-2 convs still materialize im2col patches in the wrapper;
    # they are a small fraction of total traffic (stem + 3 downsampling blocks).
    n, h, wd, cin = x.shape
    cout, _, kh, kw = w.shape
    if kh == 1 and kw == 1:
        xs = x[:, ::stride, ::stride, :]
        ho, wo = xs.shape[1], xs.shape[2]
        a = xs.reshape(n * ho * wo, cin)
    else:
        patches, ho, wo = _extract_patches(x, kh, kw, stride, pad, 0.0)
        a = patches.reshape(n * ho * wo, kh * kw * cin)
    scale, shift = _fold_bn(bias, bn, cout)
    wmat = (jnp.transpose(w, (2, 3, 1, 0)).reshape(kh * kw * cin, cout)
            * scale[None, :]).astype(jnp.bfloat16)
    y = fused_matmul(a.astype(jnp.bfloat16), wmat, shift.reshape(1, cout), relu)
    return y.reshape(n, ho, wo, cout)


def conv_transpose_2x2_s2(x, w, bias):
    """ConvTranspose2d(k=2, s=2). torch weight layout (Cin, Cout, 2, 2)."""
    n, h, wd, cin = x.shape
    _, cout, _, _ = w.shape
    a = x.reshape(n * h * wd, cin).astype(jnp.bfloat16)
    wmat = w.reshape(cin, cout * 4).astype(jnp.bfloat16)   # col = co*4 + di*2 + dj
    shift = jnp.repeat(bias, 4).reshape(1, cout * 4)
    y = fused_matmul(a, wmat, shift, relu=False)
    y = y.reshape(n, h, wd, cout, 2, 2)
    y = jnp.transpose(y, (0, 1, 4, 2, 5, 3))                # (N, H, di, W, dj, Co)
    return y.reshape(n, 2 * h, 2 * wd, cout)


def maxpool_3x3_s2_p1(x):
    # TODO(synk): maxpool still builds 9 decimated copies in the wrapper; it runs
    # once on a small 64-channel map so the extra HBM traffic is negligible.
    n, h, wd, c = x.shape
    ho = (h + 2 - 3) // 2 + 1
    wo = (wd + 2 - 3) // 2 + 1
    xp = jnp.pad(x, ((0, 0), (1, 1), (1, 1), (0, 0)), constant_values=-jnp.inf)
    taps = []
    for i in range(3):
        for j in range(3):
            taps.append(xp[:, i:i + 2 * ho:2, j:j + 2 * wo:2, :].reshape(n, ho * wo, c))
    patches = jnp.stack(taps, axis=1)                      # (N, 9, Ho*Wo, C)
    y = pl.pallas_call(
        _maxpool_kernel,
        out_shape=jax.ShapeDtypeStruct((n, ho * wo, c), x.dtype),
        grid=(n,),
        in_specs=[pl.BlockSpec((1, 9, ho * wo, c), lambda b: (b, 0, 0, 0))],
        out_specs=pl.BlockSpec((1, ho * wo, c), lambda b: (b, 0, 0)),
        compiler_params=pltpu.CompilerParams(
            dimension_semantics=("parallel",),
            vmem_limit_bytes=_VMEM_LIMIT,
        ),
    )(patches)
    return y.reshape(n, ho, wo, c)


# ----------------------------------------------------------------------------
# Deterministic parameter construction (synthetic; no checkpoint load)
# ----------------------------------------------------------------------------
# TODO(synk): torchvision "pretrained=True" weights are replaced by deterministic
# He-style init; loading real checkpoints is out of scope for this script.
class ParamGen:
    def __init__(self, seed=0):
        self.key = jax.random.PRNGKey(seed)
        self.count = 0

    def normal(self, shape, std):
        self.count += 1
        k = jax.random.fold_in(self.key, self.count)
        return jax.random.normal(k, shape, jnp.float32) * std


def init_conv(pg, cout, cin, k, bias=True):
    fan_in = cin * k * k
    w = pg.normal((cout, cin, k, k), (2.0 / fan_in) ** 0.5)
    b = pg.normal((cout,), 0.01) if bias else None
    return {"w": w, "b": b}


def init_bn(pg, c):
    gamma = 1.0 + 0.1 * pg.normal((c,), 1.0)
    beta = 0.1 * pg.normal((c,), 1.0)
    return (gamma, beta, jnp.zeros((c,), jnp.float32), jnp.ones((c,), jnp.float32))


def init_convblock(pg, c):
    return {"conv1": init_conv(pg, c, c, 3, True), "bn1": init_bn(pg, c),
            "conv2": init_conv(pg, c, c, 3, True), "bn2": init_bn(pg, c)}


def init_basicblock(pg, cin, cout, stride):
    p = {"stride": stride,
         "conv1": init_conv(pg, cout, cin, 3, False), "bn1": init_bn(pg, cout),
         "conv2": init_conv(pg, cout, cout, 3, False), "bn2": init_bn(pg, cout)}
    if stride != 1 or cin != cout:
        p["ds_conv"] = init_conv(pg, cout, cin, 1, False)
        p["ds_bn"] = init_bn(pg, cout)
    return p


def init_resnet18(pg):
    p = {"conv1": init_conv(pg, 64, 3, 7, False), "bn1": init_bn(pg, 64)}
    layers, cin = [], 64
    for cout, stride in [(64, 1), (128, 2), (256, 2), (512, 2)]:
        layers.append([init_basicblock(pg, cin, cout, stride),
                       init_basicblock(pg, cout, cout, 1)])
        cin = cout
    p["layers"] = layers
    return p


def init_decoder(pg, cin, cout):
    fan_in = cin * 4
    return {"up_w": pg.normal((cin, cout, 2, 2), (2.0 / fan_in) ** 0.5),
            "up_b": pg.normal((cout,), 0.01),
            "conv": init_convblock(pg, cout)}


def init_depth_model(seed=0):
    pg = ParamGen(seed)
    return {"resnet": init_resnet18(pg),
            "bridge": [init_convblock(pg, 512), init_convblock(pg, 512)],
            "decoders": [init_decoder(pg, ci, co)
                         for ci, co in [(512, 256), (256, 128), (128, 64),
                                        (64, 32), (32, 1)]]}


# ----------------------------------------------------------------------------
# forward passes
# ----------------------------------------------------------------------------
def convblock_forward(p, x):
    x = conv3x3_bn_relu(x, p["conv1"]["w"], p["conv1"]["b"], p["bn1"], True)
    x = conv3x3_bn_relu(x, p["conv2"]["w"], p["conv2"]["b"], p["bn2"], True)
    return x


def basicblock_forward(p, x):
    s = p["stride"]
    if "ds_conv" in p:
        identity = conv_bn_relu_matmul(x, p["ds_conv"]["w"], None, p["ds_bn"],
                                       s, 0, False)
    else:
        identity = x
    if s == 1:
        out = conv3x3_bn_relu(x, p["conv1"]["w"], None, p["bn1"], True)
    else:
        out = conv_bn_relu_matmul(x, p["conv1"]["w"], None, p["bn1"], s, 1, True)
    # relu(bn2(conv2(out)) + identity) -- residual fused into the kernel epilogue
    out = conv3x3_bn_relu(out, p["conv2"]["w"], None, p["bn2"], True,
                          residual=identity)
    return out


def resnet18_features(p, x):
    x = conv_bn_relu_matmul(x, p["conv1"]["w"], None, p["bn1"], 2, 3, True)
    x = maxpool_3x3_s2_p1(x)
    for layer in p["layers"]:
        for blk in layer:
            x = basicblock_forward(blk, x)
    return x


def decoder_forward(p, x):
    x = conv_transpose_2x2_s2(x, p["up_w"], p["up_b"])
    return convblock_forward(p["conv"], x)


def _pad_decoder_params(p, cpad):
    """Zero-pad the final DecoderBlock(32->1) to cpad channels (lane-dense)."""
    cin_up, cout = p["up_w"].shape[0], p["up_w"].shape[1]
    up_w = jnp.zeros((cin_up, cpad, 2, 2), jnp.float32).at[:, :cout].set(p["up_w"])
    up_b = jnp.zeros((cpad,), jnp.float32).at[:cout].set(p["up_b"])

    def pad_conv(cp):
        w = jnp.zeros((cpad, cpad, 3, 3), jnp.float32).at[:cout, :cout].set(cp["w"])
        b = jnp.zeros((cpad,), jnp.float32).at[:cout].set(cp["b"])
        return {"w": w, "b": b}

    def pad_bn(bn):
        g, be, mu, va = bn
        return (jnp.ones((cpad,), jnp.float32).at[:cout].set(g),
                jnp.zeros((cpad,), jnp.float32).at[:cout].set(be),
                jnp.zeros((cpad,), jnp.float32).at[:cout].set(mu),
                jnp.ones((cpad,), jnp.float32).at[:cout].set(va))

    c = p["conv"]
    return {"up_w": up_w, "up_b": up_b,
            "conv": {"conv1": pad_conv(c["conv1"]), "bn1": pad_bn(c["bn1"]),
                     "conv2": pad_conv(c["conv2"]), "bn2": pad_bn(c["bn2"])}}


def depth_model_forward(params, x_nchw):
    x = jnp.transpose(x_nchw, (0, 2, 3, 1)).astype(jnp.bfloat16)  # NCHW -> NHWC
    x = resnet18_features(params["resnet"], x)
    for cb in params["bridge"]:
        x = convblock_forward(cb, x)
    decs = params["decoders"]
    for dec in decs[:-1]:
        x = decoder_forward(dec, x)
    # final 1-channel decoder: run with channels padded to 128, slice channel 0
    x = decoder_forward(_pad_decoder_params(decs[-1], _FINAL_CPAD), x)
    x = x[..., :1]
    return jnp.transpose(x, (0, 3, 1, 2)).astype(jnp.float32)     # NHWC -> NCHW


# ----------------------------------------------------------------------------
if __name__ == "__main__":
    key = jax.random.PRNGKey(0)
    k1, k2, k3, k4, k5 = jax.random.split(key, 5)

    # 1) fused matmul kernel sanity check (bf16 MXU, f32 accumulate / epilogue)
    a = jax.random.normal(k1, (64, 40), jnp.float32)
    w = jax.random.normal(k2, (40, 24), jnp.float32) * 0.2
    shift = jnp.linspace(-0.2, 0.2, 24, dtype=jnp.float32).reshape(1, 24)
    got = fused_matmul(a.astype(jnp.bfloat16), w.astype(jnp.bfloat16), shift,
                       relu=True)
    ref = jnp.maximum(
        jnp.dot(a.astype(jnp.bfloat16).astype(jnp.float32),
                w.astype(jnp.bfloat16).astype(jnp.float32)) + shift, 0.0)
    assert jnp.allclose(got.astype(jnp.float32), ref, atol=5e-2, rtol=5e-2), \
        "fused matmul kernel mismatch"

    # 2) direct 3x3 conv kernel sanity check against lax.conv
    xc = jax.random.normal(k3, (2, 8, 8, 16), jnp.float32) * 0.5
    wc = jax.random.normal(k4, (24, 16, 3, 3), jnp.float32) * 0.1
    bc = jax.random.normal(k5, (24,), jnp.float32) * 0.05
    got = conv3x3_bn_relu(xc.astype(jnp.bfloat16), wc, bc, None, True)
    w_hwio = jnp.transpose(wc, (2, 3, 1, 0)).astype(jnp.bfloat16).astype(jnp.float32)
    ref = jax.lax.conv_general_dilated(
        xc.astype(jnp.bfloat16).astype(jnp.float32), w_hwio, (1, 1), "SAME",
        dimension_numbers=("NHWC", "HWIO", "NHWC"))
    ref = jnp.maximum(ref + bc, 0.0)
    assert jnp.allclose(got.astype(jnp.float32), ref, atol=5e-2, rtol=5e-2), \
        "direct 3x3 conv kernel mismatch"

    # 3) full DepthModel forward
    params = init_depth_model(seed=0)
    x = jax.random.normal(key, (2, 3, 64, 64), jnp.float32)   # NCHW like PyTorch
    fwd = jax.jit(lambda inp: depth_model_forward(params, inp))
    out = jax.block_until_ready(fwd(x))
    assert out.shape == (2, 1, 64, 64), out.shape
    assert bool(jnp.all(jnp.isfinite(out)))
    print("KERNEL_OK")
</pallas_src>

<mosaic_0001>
module attributes {stable_mosaic.version = 11 : i64} {
  func.func @_matmul_kernel(%arg0: i32, %arg1: memref<64x40xbf16, #tpu.memory_space<vmem>>, %arg2: memref<40x24xbf16, #tpu.memory_space<vmem>>, %arg3: memref<1x24xf32, #tpu.memory_space<vmem>>, %arg4: memref<64x24xbf16, #tpu.memory_space<vmem>>) attributes {dimension_semantics = [#tpu.dimension_semantics<parallel>], iteration_bounds = array<i64: 1>, scalar_prefetch = 0 : i64, scratch_operands = 0 : i64, tpu.core_type = #tpu.core_type<tc>, window_params = [{transform_indices = @transform_0, window_bounds = array<i64: 64, 40>}, {pipeline_mode = #tpu.pipeline_mode<synchronous>, transform_indices = @transform_1, window_bounds = array<i64: 40, 24>}, {pipeline_mode = #tpu.pipeline_mode<synchronous>, transform_indices = @transform_2, window_bounds = array<i64: 1, 24>}, {transform_indices = @transform_3, window_bounds = array<i64: 64, 24>}]} {
    %c0 = arith.constant 0 : index
    %c0_0 = arith.constant 0 : index
    %0 = vector.load %arg1[%c0, %c0_0] : memref<64x40xbf16, #tpu.memory_space<vmem>>, vector<64x40xbf16>
    %c0_1 = arith.constant 0 : index
    %c0_2 = arith.constant 0 : index
    %1 = vector.load %arg2[%c0_1, %c0_2] : memref<40x24xbf16, #tpu.memory_space<vmem>>, vector<40x24xbf16>
    %cst = arith.constant dense<0.000000e+00> : vector<64x24xf32>
    %2 = tpu.matmul %0, %1, %cst {dimension_numbers = #tpu.dot_dimension_numbers<[1], [0], [0], [1], [0, 0, 1, 1], [], []>} : vector<64x40xbf16>, vector<40x24xbf16>, vector<64x24xf32> -> vector<64x24xf32>
    %c0_3 = arith.constant 0 : index
    %c0_4 = arith.constant 0 : index
    %3 = vector.load %arg3[%c0_3, %c0_4] : memref<1x24xf32, #tpu.memory_space<vmem>>, vector<1x24xf32>
    %4 = vector.broadcast %3 : vector<1x24xf32> to vector<64x24xf32>
    %5 = arith.addf %2, %4 : vector<64x24xf32>
    %cst_5 = arith.constant 0.000000e+00 : f32
    %6 = vector.broadcast %cst_5 : f32 to vector<64x24xf32>
    %7 = arith.maximumf %5, %6 : vector<64x24xf32>
    %8 = arith.truncf %7 : vector<64x24xf32> to vector<64x24xbf16>
    %c0_6 = arith.constant 0 : index
    %c0_7 = arith.constant 0 : index
    %9 = vector.load %arg4[%c0_6, %c0_7] : memref<64x24xbf16, #tpu.memory_space<vmem>>, vector<64x24xbf16>
    tpu.vector_store %arg4[%c0_6, %c0_7], %8 {strides = array<i32>} : memref<64x24xbf16, #tpu.memory_space<vmem>>, vector<64x24xbf16>,
    return
  }
  func.func @transform_0(%arg0: i32) -> (i32, i32) {
    %c0_i32 = arith.constant 0 : i32
    %c0_i32_0 = arith.constant 0 : i32
    return %arg0, %c0_i32 : i32, i32
  }
  func.func @transform_1(%arg0: i32) -> (i32, i32) {
    %c0_i32 = arith.constant 0 : i32
    %c0_i32_0 = arith.constant 0 : i32
    %c0_i32_1 = arith.constant 0 : i32
    return %c0_i32, %c0_i32_0 : i32, i32
  }
  func.func @transform_2(%arg0: i32) -> (i32, i32) {
    %c0_i32 = arith.constant 0 : i32
    %c0_i32_0 = arith.constant 0 : i32
    %c0_i32_1 = arith.constant 0 : i32
    return %c0_i32, %c0_i32_0 : i32, i32
  }
  func.func @transform_3(%arg0: i32) -> (i32, i32) {
    %c0_i32 = arith.constant 0 : i32
    %c0_i32_0 = arith.constant 0 : i32
    return %arg0, %c0_i32 : i32, i32
  }
}

</mosaic_0001>

<bundles_post_ra>
// kernel: tpu_custom_call.1
= control target key start
LH: loop header
LB: loop body
LE: loop exit
PB: predicated region body
PF: predicated region fallthrough
CT: control target
= control target key end

     0   :  { %vm70_vm0 = vcmask 326656   ;;  %vm83_vm1 = vcmask 1043456   ;;  %vm192_vm2 = vcmask 191488   ;;  %s349_s1 = inlined_call_operand.vmem [shape: bf16[40,24], index: 1, kind: input, shape index: {}]   ;;  %s350_s0 = inlined_call_operand.vmem [shape: bf16[64,40], index: 0, kind: input, shape index: {}]   ;;  %s351_s2 = inlined_call_operand.vmem [shape: f32[1,24], index: 2, kind: input, shape index: {}]   ;;  %s352_s3 = inlined_call_operand.vmem [shape: bf16[64,24], index: 3, kind: output, shape index: {}]  }
   0x1   :  { %v262_v0 = vld [vmem:[%s349_s1] sm:$0xff]   ;;  %v263_v1 = vld [vmem:[%s349_s1 + $0x8] sm:$0xff]   ;;  %v264_v2 = vld [vmem:[%s349_s1 + $0x10] ss:$0 sps:$4 sm:$0xff]  }
   0x2   :  { %240 = vmatprep.subr.bf16.mxu0 %v262_v0  ;;  %254 = vmatprep.subr.bf16.mxu1 %v262_v0  ;;  %v265_v3 = vld [vmem:[%s350_s0] sm:$0xff]   ;;  %v266_v4 = vld [vmem:[%s350_s0 + $0x10] sm:$0xff]   ;;  %v85_v5 = vsel %vm83_vm1, %v264_v2, 0  ;;  %v267_v6 = vld [vmem:[%s350_s0 + $0x8] sm:$0xff]  }
   0x3   :  { %241 = vmatpush3.bf16.msra.mxu0 %v262_v0  ;;  %257 = vmatpush3.bf16.msra.mxu1 %v262_v0  ;;  %v268_v7 = vld [vmem:[%s350_s0 + $0x18] sm:$0xff]   ;;  %v205_v8 = vld [vmem:[%s351_s2] ss:$0 sm:$0xff] }
   0x4   :  { %242 = vmatprep.subr.bf16.mxu0 %v263_v1  ;;  %255 = vmatprep.subr.bf16.mxu1 %v263_v1 }
   0x5   :  { %246 = vmatprep.mubr.msk.bf16.mxu0 %vm70_vm0, %v265_v3  ;;  %250 = vmatprep.mubr.msk.bf16.mxu1 %vm70_vm0, %v266_v4 }
   0x7   :  { %243 = vmatpush3.bf16.msra.mxu0 %v263_v1  ;;  %258 = vmatpush3.bf16.msra.mxu1 %v263_v1 }
   0x8   :  { %260 = vmatprep.subr.msk.bf16.mxu0 %vm83_vm1, %v264_v2  ;;  %261 = vmatprep.subr.msk.bf16.mxu1 %vm83_vm1, %v264_v2 }
   0xb   :  { %245 = vmatpush3.bf16.msra.mxu0 %v85_v5  ;;  %259 = vmatpush3.bf16.msra.mxu1 %v85_v5 }
   0xe   :  { %247 = vmatmul.mubr.msk.bf16.vlgmr.msra.gmra.mrb[0].mxu0 %vm70_vm0, %v267_v6  ;;  %251 = vmatmul.mubr.msk.bf16.vlgmr.msra.gmra.mrb[0].mxu1 %vm70_vm0, %v268_v7 }
  0xe1   :  { %v248_v9 = vpop.f32.mrb[0].mxu0  ;;  %v252_v10 = vpop.f32.mrb[0].mxu1 }
  0xe2   :  { %v130_v11 = vadd.f32 %v248_v9, %v205_v8  ;;  %v146_v12 = vadd.f32 %v252_v10, %v205_v8  ;;  %v121_v13 = vpop.f32.mrb[1].mxu0  ;;  %v137_v14 = vpop.f32.mrb[1].mxu1 }
  0xe3   :  { %v122_v15 = vadd.f32 %v205_v8, %v121_v13  ;;  %v138_v16 = vadd.f32 %v205_v8, %v137_v14  ;;  %v249_v17 = vpop.f32.mrb[2].mxu0  ;;  %v253_v18 = vpop.f32.mrb[2].mxu1 }
  0xe4   :  { %v154_v19 = vmax.f32 %v130_v11, 0.0  ;;  %v158_v20 = vmax.f32 %v146_v12, 0.0  ;;  %v133_v21 = vadd.f32 %v249_v17, %v205_v8  ;;  %v149_v22 = vadd.f32 %v253_v18, %v205_v8  ;;  %v124_v23 = vpop.f32.mrb[3].mxu0  ;;  %v140_v24 = vpop.f32.mrb[3].mxu1 }
  0xe5   :  { %v152_v25 = vmax.f32 %v122_v15, 0.0  ;;  %v156_v26 = vmax.f32 %v138_v16, 0.0  ;;  %v125_v27 = vadd.f32 %v205_v8, %v124_v23  ;;  %v141_v28 = vadd.f32 %v205_v8, %v140_v24 }
  0xe6   :  { %v227_v29 = vpack.c.bf16 %v154_v19, %v154_v19  ;;  %v231_v30 = vpack.c.bf16 %v158_v20, %v158_v20  ;;  %v155_v31 = vmax.f32 %v133_v21, 0.0  ;;  %v159_v32 = vmax.f32 %v149_v22, 0.0 }
  0xe7   :  { %v225_v33 = vpack.c.bf16 %v152_v25, %v152_v25  ;;  %v229_v34 = vpack.c.bf16 %v156_v26, %v156_v26  ;;  %v153_v35 = vmax.f32 %v125_v27, 0.0  ;;  %v157_v36 = vmax.f32 %v141_v28, 0.0 }
  0xe8   :  { %195 = vst.msk [vmem:[%s352_s3 + $0x8] sm:$0xf] %vm192_vm2, %v227_v29  ;;  %199 = vst.msk [vmem:[%s352_s3 + $0x18] sm:$0xf] %vm192_vm2, %v231_v30  ;;  %v228_v37 = vpack.c.bf16 %v155_v31, %v155_v31  ;;  %v232_v38 = vpack.c.bf16 %v159_v32, %v159_v32 }
  0xe9   :  { %193 = vst.msk [vmem:[%s352_s3] sm:$0xf] %vm192_vm2, %v225_v33  ;;  %197 = vst.msk [vmem:[%s352_s3 + $0x10] sm:$0xf] %vm192_vm2, %v229_v34  ;;  %v226_v39 = vpack.c.bf16 %v153_v35, %v153_v35  ;;  %v230_v40 = vpack.c.bf16 %v157_v36, %v157_v36 }
  0xea   :  { %196 = vst.msk [vmem:[%s352_s3 + $0xc] sm:$0xf] %vm192_vm2, %v228_v37  ;;  %200 = vst.msk [vmem:[%s352_s3 + $0x1c] sm:$0xf] %vm192_vm2, %v232_v38 }
  0xeb   :  { %194 = vst.msk [vmem:[%s352_s3 + $0x4] sm:$0xf] %vm192_vm2, %v226_v39  ;;  %198 = vst.msk [vmem:[%s352_s3 + $0x14] sm:$0xf] %vm192_vm2, %v230_v40 }

</bundles_post_ra>
